<compile_context>
chip_gen: v7x
topology: tpu7x:2x2x1
jax: 0.10.0
libtpu: 0.0.40
codegen_flags: <defaults>
</compile_context>

<pallas_src>
import jax
import jax.numpy as jnp
from jax.experimental import pallas as pl
from jax.experimental.pallas import tpu as pltpu

_TILE_B = 8192            # lane-axis batch tile for the grid path (mult. of 128)
_SINGLE_TILE_MAX = 32768  # at or below this, run as one grid-free block
_VMEM_LIMIT_BYTES = 64 * 1024 * 1024


def mlp_kernel(p_ref, xt_ref, o_ref):
    xt = xt_ref[...]                        # (3, tile_b)  batch on lanes
    p = p_ref[...]                          # (16, 128)    packed params

    w1t = p[0:10, 0:3]                      # (10, 3)  w1t[j, k] = W1[k, j]
    b1 = p[0:10, 3:4]                       # (10, 1)
    w2 = p[0:10, 4:5]                       # (10, 1)
    b2 = p[0:1, 5:6]                        # (1, 1)

    # fc1 + ReLU: three broadcast multiply-adds on the VPU (no MXU for K=3).
    h = (w1t[:, 0:1] * xt[0:1, :]
         + w1t[:, 1:2] * xt[1:2, :]
         + w1t[:, 2:3] * xt[2:3, :]
         + b1)                              # (10, tile_b)
    h = jnp.maximum(h, 0.0)

    # fc3: VPU multiply + sublane reduce (XLU); N=1 so no matmul.
    z = jnp.sum(h * w2, axis=0, keepdims=True) + b2      # (1, tile_b)

    # sigmoid(z) = 0.5 * (tanh(z/2) + 1): keeps the transcendental on the EUP
    # slot instead of a VALU divide; numerically identical to lax.logistic.
    o_ref[...] = (0.5 * (jnp.tanh(0.5 * z) + 1.0)).astype(o_ref.dtype)


def pack_params(w1, b1, w2, b2):
    """Pack fc1/fc3 weights + biases into a single (16, 128) f32 VMEM slab."""
    slab = jnp.zeros((16, 128), jnp.float32)
    slab = slab.at[0:10, 0:3].set(w1.T.astype(jnp.float32))           # W1^T
    slab = slab.at[0:10, 3].set(b1.reshape(-1).astype(jnp.float32))   # b1
    slab = slab.at[0:10, 4].set(w2.reshape(-1).astype(jnp.float32))   # W2 col
    slab = slab.at[0, 5].set(b2.reshape(()).astype(jnp.float32))      # b2
    return slab


def net_forward(x, w1, b1, w2, b2, *, tile_b=_TILE_B,
                single_tile_max=_SINGLE_TILE_MAX):
    """sigmoid(relu(x @ w1 + b1) @ w2 + b2); x: (B, 3) -> (B, 1).

    NOTE: weights are stored transposed vs. PyTorch's Linear (i.e. (in, out)):
    w1 (3, 10), w2 (10, 1). A checkpoint loader coming from torch must
    transpose W1/W2 accordingly or results will be silently wrong.
    """
    B = x.shape[0]
    params = pack_params(w1, b1, w2, b2)

    # Feature-major layout so the batch lives on lanes inside the kernel and
    # the output store is lane-dense. (See TODO above about producer-side
    # feature-major input; no padding copy is needed anymore.)
    xt = jnp.transpose(x).astype(jnp.float32)            # (3, B)

    if B <= single_tile_max:
        # One grid-free block: avoids per-step pipeline overhead entirely.
        grid = (1,)
        blk_b = B
    else:
        # Large batches: big lane tiles amortise the ~0.35us/step overhead and
        # give v7x's 2 TensorCores >= 5 "parallel" steps to share. The last
        # block may be partial; Pallas masks its out-of-bounds writes.
        grid = (pl.cdiv(B, tile_b),)
        blk_b = tile_b

    out_row = pl.pallas_call(
        mlp_kernel,
        out_shape=jax.ShapeDtypeStruct((1, B), jnp.float32),
        grid_spec=pltpu.PrefetchScalarGridSpec(
            num_scalar_prefetch=0,
            grid=grid,
            in_specs=[
                # Constant index_map -> the 8 KiB param slab is DMA'd once.
                pl.BlockSpec((16, 128), lambda i: (0, 0)),
                pl.BlockSpec((3, blk_b), lambda i: (0, i)),   # x^T batch tile
            ],
            out_specs=pl.BlockSpec((1, blk_b), lambda i: (0, i)),
        ),
        compiler_params=pltpu.CompilerParams(
            # Batch axis is independent -> shard across v7x's 2 TensorCores.
            dimension_semantics=("parallel",),
            vmem_limit_bytes=_VMEM_LIMIT_BYTES),
    )(params, xt)

    return out_row.reshape(B, 1)


def init_params(key):
    """Deterministic init mimicking PyTorch Linear default:
    U(-1/sqrt(fan_in), 1/sqrt(fan_in)) for both weight and bias."""
    k1, k2, k3, k4 = jax.random.split(key, 4)
    bound1 = 1.0 / jnp.sqrt(3.0)
    bound2 = 1.0 / jnp.sqrt(10.0)
    w1 = jax.random.uniform(k1, (3, 10), jnp.float32, -bound1, bound1)
    b1 = jax.random.uniform(k2, (10,), jnp.float32, -bound1, bound1)
    w2 = jax.random.uniform(k3, (10, 1), jnp.float32, -bound2, bound2)
    b2 = jax.random.uniform(k4, (1,), jnp.float32, -bound2, bound2)
    return w1, b1, w2, b2


if __name__ == "__main__":
    key = jax.random.PRNGKey(0)
    kx, kp, kx2 = jax.random.split(key, 3)

    w1, b1, w2, b2 = init_params(kp)

    def ref_fwd(xv):
        h = jnp.maximum(jnp.dot(xv, w1, precision="highest") + b1, 0.0)
        return jax.nn.sigmoid(jnp.dot(h, w2, precision="highest") + b2)

    # 1) Small batch -> single grid-free block path.
    B = 8
    x = jax.random.normal(kx, (B, 3), jnp.float32)
    out = jax.block_until_ready(net_forward(x, w1, b1, w2, b2))
    assert out.shape == (B, 1)
    assert jnp.allclose(out, ref_fwd(x), atol=1e-5, rtol=1e-5)

    # 2) Exercise the tiled grid path (cdiv grid + masked partial last block)
    #    at a small scale by overriding the tile thresholds.
    B2 = 300
    x2 = jax.random.normal(kx2, (B2, 3), jnp.float32)
    out2 = jax.block_until_ready(
        net_forward(x2, w1, b1, w2, b2, tile_b=128, single_tile_max=64))
    assert out2.shape == (B2, 1)
    assert jnp.allclose(out2, ref_fwd(x2), atol=1e-5, rtol=1e-5)

    print("KERNEL_OK")
</pallas_src>

<mosaic_0001>
module attributes {stable_mosaic.version = 11 : i64} {
  func.func @mlp_kernel(%arg0: i32, %arg1: memref<16x128xf32, #tpu.memory_space<vmem>>, %arg2: memref<3x8xf32, #tpu.memory_space<vmem>>, %arg3: memref<1x8xf32, #tpu.memory_space<vmem>>) attributes {dimension_semantics = [#tpu.dimension_semantics<parallel>], iteration_bounds = array<i64: 1>, scalar_prefetch = 0 : i64, scratch_operands = 0 : i64, tpu.core_type = #tpu.core_type<tc>, window_params = [{pipeline_mode = #tpu.pipeline_mode<synchronous>, transform_indices = @transform_0, window_bounds = array<i64: 16, 128>}, {transform_indices = @transform_1, window_bounds = array<i64: 3, 8>}, {transform_indices = @transform_2, window_bounds = array<i64: 1, 8>}]} {
    %c0 = arith.constant 0 : index
    %c0_0 = arith.constant 0 : index
    %0 = vector.load %arg2[%c0, %c0_0] : memref<3x8xf32, #tpu.memory_space<vmem>>, vector<3x8xf32>
    %c0_1 = arith.constant 0 : index
    %c0_2 = arith.constant 0 : index
    %1 = vector.load %arg1[%c0_1, %c0_2] : memref<16x128xf32, #tpu.memory_space<vmem>>, vector<16x128xf32>
    %2 = vector.extract_strided_slice %1 {offsets = [0, 0], sizes = [10, 3], strides = [1, 1]} : vector<16x128xf32> to vector<10x3xf32>
    %3 = vector.extract_strided_slice %1 {offsets = [0, 3], sizes = [10, 1], strides = [1, 1]} : vector<16x128xf32> to vector<10x1xf32>
    %4 = vector.extract_strided_slice %1 {offsets = [0, 4], sizes = [10, 1], strides = [1, 1]} : vector<16x128xf32> to vector<10x1xf32>
    %5 = vector.extract_strided_slice %1 {offsets = [0, 5], sizes = [1, 1], strides = [1, 1]} : vector<16x128xf32> to vector<1x1xf32>
    %6 = vector.extract_strided_slice %2 {offsets = [0, 0], sizes = [10, 1], strides = [1, 1]} : vector<10x3xf32> to vector<10x1xf32>
    %7 = vector.extract_strided_slice %0 {offsets = [0, 0], sizes = [1, 8], strides = [1, 1]} : vector<3x8xf32> to vector<1x8xf32>
    %8 = vector.broadcast %6 : vector<10x1xf32> to vector<10x8xf32>
    %9 = vector.broadcast %7 : vector<1x8xf32> to vector<10x8xf32>
    %10 = arith.mulf %8, %9 : vector<10x8xf32>
    %11 = vector.extract_strided_slice %2 {offsets = [0, 1], sizes = [10, 1], strides = [1, 1]} : vector<10x3xf32> to vector<10x1xf32>
    %12 = vector.extract_strided_slice %0 {offsets = [1, 0], sizes = [1, 8], strides = [1, 1]} : vector<3x8xf32> to vector<1x8xf32>
    %13 = vector.broadcast %11 : vector<10x1xf32> to vector<10x8xf32>
    %14 = vector.broadcast %12 : vector<1x8xf32> to vector<10x8xf32>
    %15 = arith.mulf %13, %14 : vector<10x8xf32>
    %16 = arith.addf %10, %15 : vector<10x8xf32>
    %17 = vector.extract_strided_slice %2 {offsets = [0, 2], sizes = [10, 1], strides = [1, 1]} : vector<10x3xf32> to vector<10x1xf32>
    %18 = vector.extract_strided_slice %0 {offsets = [2, 0], sizes = [1, 8], strides = [1, 1]} : vector<3x8xf32> to vector<1x8xf32>
    %19 = vector.broadcast %17 : vector<10x1xf32> to vector<10x8xf32>
    %20 = vector.broadcast %18 : vector<1x8xf32> to vector<10x8xf32>
    %21 = arith.mulf %19, %20 : vector<10x8xf32>
    %22 = arith.addf %16, %21 : vector<10x8xf32>
    %23 = vector.broadcast %3 : vector<10x1xf32> to vector<10x8xf32>
    %24 = arith.addf %22, %23 : vector<10x8xf32>
    %cst = arith.constant 0.000000e+00 : f32
    %25 = vector.broadcast %cst : f32 to vector<10x8xf32>
    %26 = arith.maximumf %24, %25 : vector<10x8xf32>
    %27 = vector.broadcast %4 : vector<10x1xf32> to vector<10x8xf32>
    %28 = arith.mulf %26, %27 : vector<10x8xf32>
    %cst_3 = arith.constant dense<0.000000e+00> : vector<8xf32>
    %29 = vector.multi_reduction <add>, %28, %cst_3 [0] : vector<10x8xf32> to vector<8xf32>
    %30 = vector.shape_cast %29 : vector<8xf32> to vector<1x8xf32>
    %31 = vector.broadcast %5 : vector<1x1xf32> to vector<1x8xf32>
    %32 = arith.addf %30, %31 : vector<1x8xf32>
    %cst_4 = arith.constant 5.000000e-01 : f32
    %33 = vector.broadcast %cst_4 : f32 to vector<1x8xf32>
    %34 = arith.mulf %33, %32 : vector<1x8xf32>
    %35 = math.tanh %34 : vector<1x8xf32>
    %cst_5 = arith.constant 1.000000e+00 : f32
    %36 = vector.broadcast %cst_5 : f32 to vector<1x8xf32>
    %37 = arith.addf %35, %36 : vector<1x8xf32>
    %cst_6 = arith.constant 5.000000e-01 : f32
    %38 = vector.broadcast %cst_6 : f32 to vector<1x8xf32>
    %39 = arith.mulf %38, %37 : vector<1x8xf32>
    %c0_7 = arith.constant 0 : index
    %c0_8 = arith.constant 0 : index
    %40 = vector.load %arg3[%c0_7, %c0_8] : memref<1x8xf32, #tpu.memory_space<vmem>>, vector<1x8xf32>
    tpu.vector_store %arg3[%c0_7, %c0_8], %39 {strides = array<i32>} : memref<1x8xf32, #tpu.memory_space<vmem>>, vector<1x8xf32>,
    return
  }
  func.func @transform_0(%arg0: i32) -> (i32, i32) {
    %c0_i32 = arith.constant 0 : i32
    %c0_i32_0 = arith.constant 0 : i32
    %c0_i32_1 = arith.constant 0 : i32
    return %c0_i32, %c0_i32_0 : i32, i32
  }
  func.func @transform_1(%arg0: i32) -> (i32, i32) {
    %c0_i32 = arith.constant 0 : i32
    %c0_i32_0 = arith.constant 0 : i32
    return %c0_i32, %arg0 : i32, i32
  }
  func.func @transform_2(%arg0: i32) -> (i32, i32) {
    %c0_i32 = arith.constant 0 : i32
    %c0_i32_0 = arith.constant 0 : i32
    return %c0_i32, %arg0 : i32, i32
  }
}

</mosaic_0001>

<bundles_post_ra>
// kernel: tpu_custom_call.1
= control target key start
LH: loop header
LB: loop body
LE: loop exit
PB: predicated region body
PF: predicated region fallthrough
CT: control target
= control target key end

     0   :  { %7 = vsyncpa [#allocation3], 0  ;;  %s304_s0 = inlined_call_operand.hbm [shape: f32[16,128], index: 0, kind: input, shape index: {}]   ;;  %s305_s1 = inlined_call_operand.hbm [shape: f32[3,8], index: 1, kind: input, shape index: {}]   ;;  %s306_s2 = inlined_call_operand.hbm [shape: f32[1,8], index: 2, kind: output, shape index: {}]  }
   0x1   :  { %8 = vsyncpa [#allocation6], 0 }
   0x2   :  { %9 = vsyncpa [#allocation4], 0  ;;  %s242_s9 = smov [#allocation2]   ;;  %s170_s13 = scalar_lea.hbm %s304_s0, 256 }
   0x3   :  { %s15_s10 = sshll.u32 %s242_s9, 4  ;;  %p171_p0 = scmp.ne.s32.totalorder %s304_s0, %s170_s13  ;;  %s16_s10 = int_to_ptr.vmem [resolvable:$true] %s15_s10 }
   0x4   :  { %p174_p1 = scmp.lt.u32.totalorder %s170_s13, %s304_s0 }
   0x6   :  { %p176_p2 = pnand %p174_p1, %p171_p0 }
   0x8   :  { %179 = shalt.err (!%p176_p2)
}
   0x9   :  { %s180_s18 = scalar_lea.vmem %s16_s10, 256  ;;  %p185_p4 = scmp.lt.s32.totalorder %s16_s10, %s16_s10 }
   0xa   :  { %p181_p3 = scmp.ne.s32.totalorder %s16_s10, %s180_s18  ;;  %p186_p5 = scmp.lt.s32.totalorder %s180_s18, %s180_s18 }
   0xc   :  { %p187_p6 = por %p186_p5, %p185_p4 }
   0xe   :  { %p188_p7 = pnand %p187_p6, %p181_p3 }
  0x10   :  { %191 = shalt.err (!%p188_p7)
}
  0x11   :  { %s243_s19 = smov 128   ;;  %s244_s20 = smov 8  }
  0x12   :  { %21 = dma.hbm_to_vmem [thread:$0]  %s304_s0, 256, %s16_s10, [#allocation3], %s243_s19, %s243_s19, %s244_s20  }
  0x13   :  { %s245_s23 = smov [#allocation5]   ;;  %s192_s27 = scalar_lea.hbm %s305_s1, 64 }
  0x14   :  { %s28_s24 = sshll.u32 %s245_s23, 4  ;;  %p193_p8 = scmp.ne.s32.totalorder %s305_s1, %s192_s27  ;;  %s29_s24 = int_to_ptr.vmem [resolvable:$true] %s28_s24 }
  0x15   :  { %p196_p9 = scmp.lt.u32.totalorder %s192_s27, %s305_s1 }
  0x17   :  { %p198_p10 = pnand %p196_p9, %p193_p8 }
  0x19   :  { %201 = shalt.err (!%p198_p10)
}
  0x1a   :  { %s202_s4 = scalar_lea.vmem %s29_s24, 64  ;;  %p207_p12 = scmp.lt.s32.totalorder %s29_s24, %s29_s24 }
  0x1b   :  { %p203_p11 = scmp.ne.s32.totalorder %s29_s24, %s202_s4  ;;  %p208_p13 = scmp.lt.s32.totalorder %s202_s4, %s202_s4 }
  0x1d   :  { %p209_p0 = por %p208_p13, %p207_p12 }
  0x1f   :  { %p210_p1 = pnand %p209_p0, %p203_p11 }
  0x21   :  { %213 = shalt.err (!%p210_p1)
}
  0x22   :  { %31 = dma.hbm_to_vmem [thread:$0]  %s305_s1, 64, %s29_s24, [#allocation6]  }
  0x23   :  { %236 = dma.done.wait [#allocation3], 256  }
  0x24   :  { %237 = vsyncadd [#allocation3], 4294967040 }
  0x25   :  { %238 = dma.done.wait [#allocation6], 64  }
  0x26   :  { %239 = vsyncadd [#allocation6], 4294967232  ;;  %v246_v0 = vmov 1   ;;  %v247_v1 = vmov 0   ;;  %v39_v2 = vld [vmem:[#allocation2] sm:$0xff]  ;;  %v40_v3 = vld [vmem:[#allocation2 + $0x8] sm:$0xff]  ;;  %v51_v8 = vlaneseq }
  0x27   :  { %161 = vset.pattern.permute.xlu1 %v246_v0  ;;  %160 = vset.pattern.permute.xlu0 %v247_v1  ;;  %v248_v4 = vmov 2   ;;  %v249_v5 = vmov 3   ;;  %v250_v6 = vmov 4   ;;  %v251_v7 = vmov 5   ;;  %v38_v12 = vld [vmem:[#allocation5] sm:$0x7] }
  0x28   :  { %58 = vperm.xlu1 %161, %v39_v2   ;;  %43 = vperm.xlu0 %160, %v39_v2   ;;  %v52_v9 = vshrl.u32 %v51_v8, 7  ;;  %vm111_vm0 = vcmask 64512   ;;  %vm113_vm1 = vcmask 58368   ;;  %s252_s1 = smov [#allocation7]   ;;  %vm131_vm2 = vcmask 57344  }
  0x29   :  { %s139_s6 = sshll.u32 %s252_s1, 4  ;;  %s140_s6 = int_to_ptr.vmem [resolvable:$true] %s139_s6 }
  0x2a   :  { %v67_v10 = vsub.s32 1, %v52_v9  ;;  %v53_v11 = vsub.s32 0, %v52_v9  ;;  %v83_v17 = vsub.s32 2, %v52_v9  ;;  %s214_s7 = scalar_lea.vmem %s140_s6, 16  ;;  %s218_s8 = scalar_lea.vmem %s140_s6, 32 }
  0x2b   :  { %p215_p2 = scmp.ne.s32.totalorder %s140_s6, %s214_s7  ;;  %p219_p3 = scmp.lt.s32.totalorder %s140_s6, %s140_s6 }
  0x2c   :  { %62 = vperm.xlu1 %161, %v40_v3   ;;  %48 = vperm.xlu0 %160, %v40_v3   ;;  %v68_v15 = vrot.slane %v38_v12, %v67_v10  ;;  %v54_v16 = vrot.slane %v38_v12, %v53_v11  ;;  %v84_v22 = vrot.slane %v38_v12, %v83_v17  ;;  %p220_p4 = scmp.lt.s32.totalorder %s218_s8, %s214_s7 }
  0x2e   :  { %p221_p5 = por %p220_p4, %p219_p3 }
  0x30   :  { %163 = vset.pattern.permute.xlu1 %v248_v4  ;;  %162 = vset.pattern.permute.xlu0 %v248_v4  ;;  %p222_p6 = pnand %p221_p5, %p215_p2 }
  0x31   :  { %78 = vperm.xlu1 %163, %v40_v3   ;;  %74 = vperm.xlu0 %162, %v39_v2  }
  0x35   :  { %164 = vset.pattern.permute.xlu1 %v249_v5  ;;  %165 = vset.pattern.permute.xlu0 %v249_v5 }
  0x36   :  { %90 = vperm.xlu1 %164, %v39_v2   ;;  %94 = vperm.xlu0 %165, %v40_v3  }
  0x3a   :  { %166 = vset.pattern.permute.xlu1 %v250_v6  ;;  %167 = vset.pattern.permute.xlu0 %v251_v7 }
  0x3b   :  { %102 = vperm.xlu1 %166, %v39_v2   ;;  %123 = vperm.xlu0 %167, %v39_v2  }
  0x3f   :  { %106 = vperm.xlu1 %166, %v40_v3  }
  0xa7   :  { %v59_v13 = vpop.permute.xlu1 %58  ;;  %v44_v14 = vpop.permute.xlu0 %43 }
  0xa8   :  { %v69_v20 = vmul.f32 %v68_v15, %v59_v13  ;;  %v55_v21 = vmul.f32 %v54_v16, %v44_v14 }
  0xaa   :  { %v71_v27 = vadd.f32 %v69_v20, %v55_v21 }
  0xab   :  { %v63_v18 = vpop.permute.xlu1 %62  ;;  %v49_v19 = vpop.permute.xlu0 %48 }
  0xac   :  { %v70_v23 = vmul.f32 %v68_v15, %v63_v18  ;;  %v56_v24 = vmul.f32 %v54_v16, %v49_v19 }
  0xae   :  { %v72_v30 = vadd.f32 %v70_v23, %v56_v24 }
  0xb0   :  { %v79_v25 = vpop.permute.xlu1 %78  ;;  %v75_v26 = vpop.permute.xlu0 %74 }
  0xb1   :  { %v86_v28 = vmul.f32 %v84_v22, %v79_v25  ;;  %v85_v29 = vmul.f32 %v84_v22, %v75_v26 }
  0xb3   :  { %v87_v31 = vadd.f32 %v85_v29, %v71_v27  ;;  %v88_v33 = vadd.f32 %v86_v28, %v72_v30 }
  0xb5   :  { %v91_v32 = vpop.permute.xlu1 %90  ;;  %v95_v35 = vpop.permute.xlu0 %94 }
  0xb6   :  { %v97_v34 = vadd.f32 %v91_v32, %v87_v31  ;;  %v98_v37 = vadd.f32 %v95_v35, %v88_v33 }
  0xb8   :  { %v99_v36 = vmax.f32 %v97_v34, 0.0  ;;  %v100_v39 = vmax.f32 %v98_v37, 0.0 }
  0xba   :  { %v103_v38 = vpop.permute.xlu1 %102  ;;  %v124_v51 = vpop.permute.xlu0 %123 }
  0xbb   :  { %v109_v40 = vmul.f32 %v103_v38, %v99_v36 }
  0xbd   :  { %v112_v43 = vsel %vm111_vm0, %v109_v40, 0.0 }
  0xbe   :  { %v107_v41 = vpop.permute.xlu1 %106 }
  0xbf   :  { %v110_v42 = vmul.f32 %v107_v41, %v100_v39 }
  0xc1   :  { %v114_v44 = vsel %vm113_vm1, %v110_v42, 0.0 }
  0xc2   :  { %v115_v45 = vadd.f32 %v114_v44, %v112_v43 }
  0xc4   :  { %v116_v46 = vrot.slane %v115_v45, 4 }
  0xc6   :  { %v117_v47 = vadd.f32 %v116_v46, %v115_v45 }
  0xc8   :  { %v118_v48 = vrot.slane %v117_v47, 2 }
  0xca   :  { %v119_v49 = vadd.f32 %v118_v48, %v117_v47 }
  0xcc   :  { %v120_v50 = vrot.slane %v119_v49, 1 }
  0xce   :  { %v121_v52 = vadd.f32 %v120_v50, %v119_v49 }
  0xd0   :  { %v126_v53 = vadd.f32 %v124_v51, %v121_v52 }
  0xd2   :  { %v127_v54 = vmul.f32 0.5, %v126_v53 }
  0xd4   :  { %168 = vtanh.f32 %v127_v54 }
  0xde   :  { %v169_v55 = vpop.eup %168 }
  0xdf   :  { %v129_v56 = vadd.f32 1.0, %v169_v55 }
  0xe1   :  { %v130_v57 = vmul.f32 0.5, %v129_v56 }
  0xe3   :  { %132 = vst.msk [vmem:[#allocation7] sm:$0x1] %vm131_vm2, %v130_v57 }
  0xe4   :  { %225 = shalt.err (!%p222_p6)
}
  0xe5   :  { %s226_s11 = scalar_lea.hbm %s306_s2, 16 }
  0xe6   :  { %p227_p7 = scmp.ne.s32.totalorder %s306_s2, %s226_s11  ;;  %p230_p8 = scmp.lt.u32.totalorder %s226_s11, %s306_s2 }
  0xe8   :  { %p232_p9 = pnand %p230_p8, %p227_p7 }
  0xea   :  { %235 = shalt.err (!%p232_p9)
}
  0xeb   :  { %142 = dma.vmem_to_hbm [thread:$0]  %s140_s6, 16, %s306_s2, [#allocation4]  }
  0xec   :  { %240 = dma.done.wait [#allocation4], 16  }
  0xed   :  { %241 = vsyncadd [#allocation4], 4294967280 }
  0xee   :  { %146 = vsyncpa [#allocation3], 1 }
  0xef   :  { %147 = vsyncpa [#allocation6], 1 }
  0xf0   :  { %148 = vsyncpa [#allocation4], 1 }

</bundles_post_ra>
